<compile_context>
chip_gen: v6e
topology: v6e:2x2x1
jax: 0.10.0
libtpu: 0.0.40
codegen_flags: <defaults>
</compile_context>

<pallas_src>
import functools

import jax
import jax.numpy as jnp
from jax.experimental import pallas as pl
from jax.experimental.pallas import tpu as pltpu


def _prepend_tokens_kernel(patches_ref, w_vis_ref, b_vis_ref,
                           w_txt_ref, b_txt_ref, out_ref, *, s_v, s_t):
    # patches_ref: (G, S_v, K) bf16    w_*: (K, D) bf16    b_*: (1, D) f32
    # out_ref    : (G, S_v + S_t, D)
    g, _, k = patches_ref.shape
    d = out_ref.shape[2]

    # --- visual tokens: one (G*S_v, K) @ (K, D) MXU pass, f32 accumulation ---
    vis = jnp.dot(patches_ref[...].reshape(g * s_v, k), w_vis_ref[...],
                  preferred_element_type=jnp.float32) + b_vis_ref[...]
    # Store before computing txt: bounds the live f32 intermediate (no spills).
    out_ref[:, :s_v, :] = vis.reshape(g, s_v, d).astype(out_ref.dtype)

    # --- text tokens: first S_t patch rows, read straight from the ref so the
    #     already-loaded full tile is never compacted across the G axis ------
    txt = jnp.dot(patches_ref[:, :s_t, :].reshape(g * s_t, k), w_txt_ref[...],
                  preferred_element_type=jnp.float32) + b_txt_ref[...]
    # torch.cat((visual, text), dim=1): adjacent, vreg-row-aligned slice.
    out_ref[:, s_v:, :] = txt.reshape(g, s_t, d).astype(out_ref.dtype)


def _vmem_capacity_bytes():
    # Trace-time hardware query; fall back to the smallest current budget (v7x).
    try:
        return int(pltpu.get_tpu_info().vmem_capacity_bytes)
    except Exception:
        return 64 * 1024 * 1024


def prepend_tokens(x, w_vis, b_vis, w_txt, b_txt, *, patch=4, s_t=8,
                   rows_per_step=None, vmem_limit_bytes=None,
                   out_dtype=jnp.bfloat16):
    """x: (B, C, H, W) image (NCHW). Returns (B, S_v + S_t, D) in out_dtype."""
    B, C, H, W = x.shape
    P = patch
    assert H % P == 0 and W % P == 0
    s_v = (H // P) * (W // P)
    K = C * P * P
    D = w_vis.shape[1]
    assert w_vis.shape == (K, D) and w_txt.shape == (K, D)
    assert b_vis.shape == (D,) and b_txt.shape == (D,)
    assert 0 < s_t <= s_v

    out_itemsize = jnp.dtype(out_dtype).itemsize
    # Concat split alignment: unmasked stores need the split on a vreg-row
    # boundary (8 rows/vreg for f32, 16 for bf16 outputs).  S_t tail rows past
    # the last full vreg are inherently partial and only a minor vst cost.
    row_align = 8 * (4 // out_itemsize)
    assert s_v % row_align == 0, f"S_v must be a multiple of {row_align}"
    assert s_t % 8 == 0, "S_t must be a multiple of 8"

    # Generation-aware budgets (v5e/v6e: 128 MiB physical VMEM; v7x: 64 MiB).
    vmem_cap = _vmem_capacity_bytes()
    if vmem_limit_bytes is None:
        vmem_limit_bytes = min(96 * 1024 * 1024,
                               max(16 * 1024 * 1024, (3 * vmem_cap) // 4))
    if rows_per_step is None:
        rows_per_step = 1536 if vmem_cap >= 100 * 1024 * 1024 else 512

    # Glue: NCHW -> (B, S_v, K) patches, bf16.  No zero-pad passes; with
    # allow_input_fusion below, XLA may fuse this transpose + cast into the
    # kernel's patches operand instead of materializing it in HBM.
    patches = x.reshape(B, C, H // P, P, W // P, P)
    patches = patches.transpose(0, 2, 4, 1, 3, 5).reshape(B, s_v, K)
    patches = patches.astype(jnp.bfloat16)

    wv = w_vis.astype(jnp.bfloat16)
    wt = w_txt.astype(jnp.bfloat16)
    bv = b_vis.astype(jnp.float32).reshape(1, D)
    bt = b_txt.astype(jnp.float32).reshape(1, D)

    # Batch-group G: large enough that the visual matmul has ~rows_per_step
    # rows, small enough that (a) the grid has >= 2 steps (double-buffer
    # overlap + v7x megacore sharding of the "parallel" axis) and (b) the
    # per-step footprint fits comfortably in the VMEM budget.  G divides B.
    def step_bytes(g_):
        patches_blk = g_ * s_v * K * 2
        out_blk = g_ * (s_v + s_t) * D * out_itemsize
        weights = 2 * K * D * 2 + 2 * D * 4
        return 2 * (patches_blk + out_blk) + 2 * weights   # conservative 2x buf

    g = max(1, min(B, rows_per_step // max(s_v, 1)))
    if B >= 2:
        g = min(g, max(1, B // 2))          # guarantee at least 2 grid steps
    while g > 1 and step_bytes(g) > vmem_limit_bytes // 2:
        g -= 1
    while B % g:
        g -= 1

    kernel = functools.partial(_prepend_tokens_kernel, s_v=s_v, s_t=s_t)

    cost = pl.CostEstimate(
        flops=2 * B * (s_v + s_t) * K * D,
        transcendentals=0,
        bytes_accessed=(B * s_v * K * 2 + 2 * K * D * 2 + 2 * D * 4
                        + B * (s_v + s_t) * D * out_itemsize),
    )

    def build(apply_optional_opts):
        # Optional knobs (JAX-version dependent): single-buffered grid-invariant
        # weights/biases and XLA fusion of the patchify producer into input 0.
        wkw = {"pipeline_mode": pl.Buffered(1)} if apply_optional_opts else {}
        cp_kwargs = dict(dimension_semantics=("parallel",),   # shards on v7x TCs
                         vmem_limit_bytes=vmem_limit_bytes)
        if apply_optional_opts:
            cp_kwargs["allow_input_fusion"] = [True, False, False, False, False]
        return pl.pallas_call(
            kernel,
            out_shape=jax.ShapeDtypeStruct((B, s_v + s_t, D), out_dtype),
            grid_spec=pltpu.PrefetchScalarGridSpec(
                num_scalar_prefetch=0,
                grid=(B // g,),
                in_specs=[
                    pl.BlockSpec((g, s_v, K), lambda i: (i, 0, 0)),      # patches
                    pl.BlockSpec((K, D), lambda i: (0, 0), **wkw),       # W_vis
                    pl.BlockSpec((1, D), lambda i: (0, 0), **wkw),       # b_vis
                    pl.BlockSpec((K, D), lambda i: (0, 0), **wkw),       # W_txt
                    pl.BlockSpec((1, D), lambda i: (0, 0), **wkw),       # b_txt
                ],
                out_specs=pl.BlockSpec((g, s_v + s_t, D), lambda i: (i, 0, 0)),
            ),
            compiler_params=pltpu.CompilerParams(**cp_kwargs),
            cost_estimate=cost,
        )

    try:
        out = build(True)(patches, wv, bv, wt, bt)
        jax.block_until_ready(out)   # surface deferred failures before committing
        return out
    except Exception:
        # Graceful degrade for JAX builds where pipeline_mode / input fusion is
        # not plumbed through the TPU pallas_call pipeline (same known-good
        # structure, identical numerics).
        return build(False)(patches, wv, bv, wt, bt)


def _reference(x, w_vis, b_vis, w_txt, b_txt, *, patch=4, s_t=8):
    B, C, H, W = x.shape
    P = patch
    s_v = (H // P) * (W // P)
    K = C * P * P
    patches = x.reshape(B, C, H // P, P, W // P, P).transpose(0, 2, 4, 1, 3, 5)
    patches = patches.reshape(B, s_v, K).astype(jnp.bfloat16)
    wv = w_vis.astype(jnp.bfloat16)
    wt = w_txt.astype(jnp.bfloat16)
    vis = jnp.dot(patches, wv,
                  preferred_element_type=jnp.float32) + b_vis[None, None, :]
    txt = jnp.dot(patches[:, :s_t, :], wt,
                  preferred_element_type=jnp.float32) + b_txt[None, None, :]
    return jnp.concatenate([vis, txt], axis=1)          # f32 reference


if __name__ == "__main__":
    # Small deterministic setup: B=2, C=4, H=W=16, patch=4 -> S_v=16, K=64;
    # hidden D=32, text seq S_t=8.  (Production D, e.g. 1152, is 128-aligned
    # so stores are lane-dense; small demo D just uses masked stores.)
    B, C, H, W = 2, 4, 16, 16
    P, D, S_T = 4, 32, 8
    K = C * P * P

    key = jax.random.PRNGKey(0)
    k_x, k_wv, k_bv, k_wt, k_bt = jax.random.split(key, 5)
    x = jax.random.normal(k_x, (B, C, H, W), dtype=jnp.float32)
    w_vis = jax.random.normal(k_wv, (K, D), dtype=jnp.float32) * 0.02
    b_vis = jax.random.normal(k_bv, (D,), dtype=jnp.float32) * 0.02
    w_txt = jax.random.normal(k_wt, (K, D), dtype=jnp.float32) * 0.02
    b_txt = jax.random.normal(k_bt, (D,), dtype=jnp.float32) * 0.02

    out = prepend_tokens(x, w_vis, b_vis, w_txt, b_txt, patch=P, s_t=S_T)
    out = jax.block_until_ready(out)

    ref = _reference(x, w_vis, b_vis, w_txt, b_txt, patch=P, s_t=S_T)
    assert out.shape == (B, (H // P) * (W // P) + S_T, D)
    # bf16 output vs f32 reference: tolerance documented for downstream users.
    assert jnp.allclose(out.astype(jnp.float32), ref, atol=2e-2, rtol=2e-2)

    print("KERNEL_OK")
</pallas_src>

<mosaic_0001>
module attributes {stable_mosaic.version = 11 : i64} {
  func.func @_prepend_tokens_kernel(%arg0: i32, %arg1: memref<1x16x64xbf16, #tpu.memory_space<vmem>>, %arg2: memref<64x32xbf16, #tpu.memory_space<vmem>>, %arg3: memref<1x32xf32, #tpu.memory_space<vmem>>, %arg4: memref<64x32xbf16, #tpu.memory_space<vmem>>, %arg5: memref<1x32xf32, #tpu.memory_space<vmem>>, %arg6: memref<1x24x32xbf16, #tpu.memory_space<vmem>>) attributes {dimension_semantics = [#tpu.dimension_semantics<parallel>], iteration_bounds = array<i64: 2>, scalar_prefetch = 0 : i64, scratch_operands = 0 : i64, tpu.core_type = #tpu.core_type<tc>, window_params = [{transform_indices = @transform_0, window_bounds = array<i64: 1, 16, 64>}, {pipeline_mode = #tpu.pipeline_mode<synchronous>, transform_indices = @transform_1, window_bounds = array<i64: 64, 32>}, {pipeline_mode = #tpu.pipeline_mode<synchronous>, transform_indices = @transform_2, window_bounds = array<i64: 1, 32>}, {pipeline_mode = #tpu.pipeline_mode<synchronous>, transform_indices = @transform_3, window_bounds = array<i64: 64, 32>}, {pipeline_mode = #tpu.pipeline_mode<synchronous>, transform_indices = @transform_4, window_bounds = array<i64: 1, 32>}, {transform_indices = @transform_5, window_bounds = array<i64: 1, 24, 32>}]} {
    %c0 = arith.constant 0 : index
    %c0_0 = arith.constant 0 : index
    %c0_1 = arith.constant 0 : index
    %0 = vector.load %arg1[%c0, %c0_0, %c0_1] : memref<1x16x64xbf16, #tpu.memory_space<vmem>>, vector<1x16x64xbf16>
    %1 = vector.shape_cast %0 : vector<1x16x64xbf16> to vector<16x64xbf16>
    %c0_2 = arith.constant 0 : index
    %c0_3 = arith.constant 0 : index
    %2 = vector.load %arg2[%c0_2, %c0_3] : memref<64x32xbf16, #tpu.memory_space<vmem>>, vector<64x32xbf16>
    %cst = arith.constant dense<0.000000e+00> : vector<16x32xf32>
    %3 = tpu.matmul %1, %2, %cst {dimension_numbers = #tpu.dot_dimension_numbers<[1], [0], [0], [1], [0, 0, 1, 1], [], []>} : vector<16x64xbf16>, vector<64x32xbf16>, vector<16x32xf32> -> vector<16x32xf32>
    %c0_4 = arith.constant 0 : index
    %c0_5 = arith.constant 0 : index
    %4 = vector.load %arg3[%c0_4, %c0_5] : memref<1x32xf32, #tpu.memory_space<vmem>>, vector<1x32xf32>
    %5 = vector.broadcast %4 : vector<1x32xf32> to vector<16x32xf32>
    %6 = arith.addf %3, %5 : vector<16x32xf32>
    %7 = vector.shape_cast %6 : vector<16x32xf32> to vector<1x16x32xf32>
    %8 = arith.truncf %7 : vector<1x16x32xf32> to vector<1x16x32xbf16>
    %c0_6 = arith.constant 0 : index
    %c0_7 = arith.constant 0 : index
    %c0_8 = arith.constant 0 : index
    %9 = vector.load %arg6[%c0_6, %c0_7, %c0_8] : memref<1x24x32xbf16, #tpu.memory_space<vmem>>, vector<1x16x32xbf16>
    tpu.vector_store %arg6[%c0_6, %c0_7, %c0_8], %8 {strides = array<i32>} : memref<1x24x32xbf16, #tpu.memory_space<vmem>>, vector<1x16x32xbf16>,
    %c0_9 = arith.constant 0 : index
    %c0_10 = arith.constant 0 : index
    %c0_11 = arith.constant 0 : index
    %10 = vector.load %arg1[%c0_9, %c0_10, %c0_11] : memref<1x16x64xbf16, #tpu.memory_space<vmem>>, vector<1x8x64xbf16>
    %11 = vector.shape_cast %10 : vector<1x8x64xbf16> to vector<8x64xbf16>
    %c0_12 = arith.constant 0 : index
    %c0_13 = arith.constant 0 : index
    %12 = vector.load %arg4[%c0_12, %c0_13] : memref<64x32xbf16, #tpu.memory_space<vmem>>, vector<64x32xbf16>
    %cst_14 = arith.constant dense<0.000000e+00> : vector<8x32xf32>
    %13 = tpu.matmul %11, %12, %cst_14 {dimension_numbers = #tpu.dot_dimension_numbers<[1], [0], [0], [1], [0, 0, 1, 1], [], []>} : vector<8x64xbf16>, vector<64x32xbf16>, vector<8x32xf32> -> vector<8x32xf32>
    %c0_15 = arith.constant 0 : index
    %c0_16 = arith.constant 0 : index
    %14 = vector.load %arg5[%c0_15, %c0_16] : memref<1x32xf32, #tpu.memory_space<vmem>>, vector<1x32xf32>
    %15 = vector.broadcast %14 : vector<1x32xf32> to vector<8x32xf32>
    %16 = arith.addf %13, %15 : vector<8x32xf32>
    %17 = vector.shape_cast %16 : vector<8x32xf32> to vector<1x8x32xf32>
    %18 = arith.truncf %17 : vector<1x8x32xf32> to vector<1x8x32xbf16>
    %c0_17 = arith.constant 0 : index
    %c16 = arith.constant 16 : index
    %c0_18 = arith.constant 0 : index
    %19 = vector.load %arg6[%c0_17, %c16, %c0_18] : memref<1x24x32xbf16, #tpu.memory_space<vmem>>, vector<1x8x32xbf16>
    tpu.vector_store %arg6[%c0_17, %c16, %c0_18], %18 {strides = array<i32>} : memref<1x24x32xbf16, #tpu.memory_space<vmem>>, vector<1x8x32xbf16>,
    return
  }
  func.func @transform_0(%arg0: i32) -> (i32, i32, i32) {
    %c0_i32 = arith.constant 0 : i32
    %c0_i32_0 = arith.constant 0 : i32
    %c0_i32_1 = arith.constant 0 : i32
    return %arg0, %c0_i32, %c0_i32_0 : i32, i32, i32
  }
  func.func @transform_1(%arg0: i32) -> (i32, i32) {
    %c0_i32 = arith.constant 0 : i32
    %c0_i32_0 = arith.constant 0 : i32
    %c0_i32_1 = arith.constant 0 : i32
    return %c0_i32, %c0_i32_0 : i32, i32
  }
  func.func @transform_2(%arg0: i32) -> (i32, i32) {
    %c0_i32 = arith.constant 0 : i32
    %c0_i32_0 = arith.constant 0 : i32
    %c0_i32_1 = arith.constant 0 : i32
    return %c0_i32, %c0_i32_0 : i32, i32
  }
  func.func @transform_3(%arg0: i32) -> (i32, i32) {
    %c0_i32 = arith.constant 0 : i32
    %c0_i32_0 = arith.constant 0 : i32
    %c0_i32_1 = arith.constant 0 : i32
    return %c0_i32, %c0_i32_0 : i32, i32
  }
  func.func @transform_4(%arg0: i32) -> (i32, i32) {
    %c0_i32 = arith.constant 0 : i32
    %c0_i32_0 = arith.constant 0 : i32
    %c0_i32_1 = arith.constant 0 : i32
    return %c0_i32, %c0_i32_0 : i32, i32
  }
  func.func @transform_5(%arg0: i32) -> (i32, i32, i32) {
    %c0_i32 = arith.constant 0 : i32
    %c0_i32_0 = arith.constant 0 : i32
    %c0_i32_1 = arith.constant 0 : i32
    return %arg0, %c0_i32, %c0_i32_0 : i32, i32, i32
  }
}

module attributes {stable_mosaic.version = 11 : i64} {
  func.func @_prepend_tokens_kernel(%arg0: i32, %arg1: memref<1x16x64xbf16, #tpu.memory_space<vmem>>, %arg2: memref<64x32xbf16, #tpu.memory_space<vmem>>, %arg3: memref<1x32xf32, #tpu.memory_space<vmem>>, %arg4: memref<64x32xbf16, #tpu.memory_space<vmem>>, %arg5: memref<1x32xf32, #tpu.memory_space<vmem>>, %arg6: memref<1x24x32xbf16, #tpu.memory_space<vmem>>) attributes {dimension_semantics = [#tpu.dimension_semantics<parallel>], iteration_bounds = array<i64: 2>, scalar_prefetch = 0 : i64, scratch_operands = 0 : i64, tpu.core_type = #tpu.core_type<tc>, window_params = [{transform_indices = @transform_0, window_bounds = array<i64: 1, 16, 64>}, {pipeline_mode = #tpu.pipeline_mode<synchronous>, transform_indices = @transform_1, window_bounds = array<i64: 64, 32>}, {pipeline_mode = #tpu.pipeline_mode<synchronous>, transform_indices = @transform_2, window_bounds = array<i64: 1, 32>}, {pipeline_mode = #tpu.pipeline_mode<synchronous>, transform_indices = @transform_3, window_bounds = array<i64: 64, 32>}, {pipeline_mode = #tpu.pipeline_mode<synchronous>, transform_indices = @transform_4, window_bounds = array<i64: 1, 32>}, {transform_indices = @transform_5, window_bounds = array<i64: 1, 24, 32>}]} {
    %c0 = arith.constant 0 : index
    %c0_0 = arith.constant 0 : index
    %c0_1 = arith.constant 0 : index
    %0 = vector.load %arg1[%c0, %c0_0, %c0_1] : memref<1x16x64xbf16, #tpu.memory_space<vmem>>, vector<1x16x64xbf16>
    %1 = vector.shape_cast %0 : vector<1x16x64xbf16> to vector<16x64xbf16>
    %c0_2 = arith.constant 0 : index
    %c0_3 = arith.constant 0 : index
    %2 = vector.load %arg2[%c0_2, %c0_3] : memref<64x32xbf16, #tpu.memory_space<vmem>>, vector<64x32xbf16>
    %cst = arith.constant dense<0.000000e+00> : vector<16x32xf32>
    %3 = tpu.matmul %1, %2, %cst {dimension_numbers = #tpu.dot_dimension_numbers<[1], [0], [0], [1], [0, 0, 1, 1], [], []>} : vector<16x64xbf16>, vector<64x32xbf16>, vector<16x32xf32> -> vector<16x32xf32>
    %c0_4 = arith.constant 0 : index
    %c0_5 = arith.constant 0 : index
    %4 = vector.load %arg3[%c0_4, %c0_5] : memref<1x32xf32, #tpu.memory_space<vmem>>, vector<1x32xf32>
    %5 = vector.broadcast %4 : vector<1x32xf32> to vector<16x32xf32>
    %6 = arith.addf %3, %5 : vector<16x32xf32>
    %7 = vector.shape_cast %6 : vector<16x32xf32> to vector<1x16x32xf32>
    %8 = arith.truncf %7 : vector<1x16x32xf32> to vector<1x16x32xbf16>
    %c0_6 = arith.constant 0 : index
    %c0_7 = arith.constant 0 : index
    %c0_8 = arith.constant 0 : index
    %9 = vector.load %arg6[%c0_6, %c0_7, %c0_8] : memref<1x24x32xbf16, #tpu.memory_space<vmem>>, vector<1x16x32xbf16>
    tpu.vector_store %arg6[%c0_6, %c0_7, %c0_8], %8 {strides = array<i32>} : memref<1x24x32xbf16, #tpu.memory_space<vmem>>, vector<1x16x32xbf16>,
    %c0_9 = arith.constant 0 : index
    %c0_10 = arith.constant 0 : index
    %c0_11 = arith.constant 0 : index
    %10 = vector.load %arg1[%c0_9, %c0_10, %c0_11] : memref<1x16x64xbf16, #tpu.memory_space<vmem>>, vector<1x8x64xbf16>
    %11 = vector.shape_cast %10 : vector<1x8x64xbf16> to vector<8x64xbf16>
    %c0_12 = arith.constant 0 : index
    %c0_13 = arith.constant 0 : index
    %12 = vector.load %arg4[%c0_12, %c0_13] : memref<64x32xbf16, #tpu.memory_space<vmem>>, vector<64x32xbf16>
    %cst_14 = arith.constant dense<0.000000e+00> : vector<8x32xf32>
    %13 = tpu.matmul %11, %12, %cst_14 {dimension_numbers = #tpu.dot_dimension_numbers<[1], [0], [0], [1], [0, 0, 1, 1], [], []>} : vector<8x64xbf16>, vector<64x32xbf16>, vector<8x32xf32> -> vector<8x32xf32>
    %c0_15 = arith.constant 0 : index
    %c0_16 = arith.constant 0 : index
    %14 = vector.load %arg5[%c0_15, %c0_16] : memref<1x32xf32, #tpu.memory_space<vmem>>, vector<1x32xf32>
    %15 = vector.broadcast %14 : vector<1x32xf32> to vector<8x32xf32>
    %16 = arith.addf %13, %15 : vector<8x32xf32>
    %17 = vector.shape_cast %16 : vector<8x32xf32> to vector<1x8x32xf32>
    %18 = arith.truncf %17 : vector<1x8x32xf32> to vector<1x8x32xbf16>
    %c0_17 = arith.constant 0 : index
    %c16 = arith.constant 16 : index
    %c0_18 = arith.constant 0 : index
    %19 = vector.load %arg6[%c0_17, %c16, %c0_18] : memref<1x24x32xbf16, #tpu.memory_space<vmem>>, vector<1x8x32xbf16>
    tpu.vector_store %arg6[%c0_17, %c16, %c0_18], %18 {strides = array<i32>} : memref<1x24x32xbf16, #tpu.memory_space<vmem>>, vector<1x8x32xbf16>,
    return
  }
  func.func @transform_0(%arg0: i32) -> (i32, i32, i32) {
    %c0_i32 = arith.constant 0 : i32
    %c0_i32_0 = arith.constant 0 : i32
    %c0_i32_1 = arith.constant 0 : i32
    return %arg0, %c0_i32, %c0_i32_0 : i32, i32, i32
  }
  func.func @transform_1(%arg0: i32) -> (i32, i32) {
    %c0_i32 = arith.constant 0 : i32
    %c0_i32_0 = arith.constant 0 : i32
    %c0_i32_1 = arith.constant 0 : i32
    return %c0_i32, %c0_i32_0 : i32, i32
  }
  func.func @transform_2(%arg0: i32) -> (i32, i32) {
    %c0_i32 = arith.constant 0 : i32
    %c0_i32_0 = arith.constant 0 : i32
    %c0_i32_1 = arith.constant 0 : i32
    return %c0_i32, %c0_i32_0 : i32, i32
  }
  func.func @transform_3(%arg0: i32) -> (i32, i32) {
    %c0_i32 = arith.constant 0 : i32
    %c0_i32_0 = arith.constant 0 : i32
    %c0_i32_1 = arith.constant 0 : i32
    return %c0_i32, %c0_i32_0 : i32, i32
  }
  func.func @transform_4(%arg0: i32) -> (i32, i32) {
    %c0_i32 = arith.constant 0 : i32
    %c0_i32_0 = arith.constant 0 : i32
    %c0_i32_1 = arith.constant 0 : i32
    return %c0_i32, %c0_i32_0 : i32, i32
  }
  func.func @transform_5(%arg0: i32) -> (i32, i32, i32) {
    %c0_i32 = arith.constant 0 : i32
    %c0_i32_0 = arith.constant 0 : i32
    %c0_i32_1 = arith.constant 0 : i32
    return %arg0, %c0_i32, %c0_i32_0 : i32, i32, i32
  }
}

</mosaic_0001>

<bundles_post_ra>
// kernel: tpu_custom_call.1
= control target key start
LH: loop header
LB: loop body
LE: loop exit
PB: predicated region body
PF: predicated region fallthrough
CT: control target
= control target key end

     0   :  { %10 = vsyncpa [#allocation3], 0  ;;  %s834_s0 = inlined_call_operand.vmem [shape: bf16[2,16,64], index: 0, kind: input, shape index: {}]   ;;  %s835_s1 = inlined_call_operand.vmem [shape: bf16[64,32], index: 1, kind: input, shape index: {}]   ;;  %s836_s2 = inlined_call_operand.vmem [shape: f32[1,32], index: 2, kind: input, shape index: {}]   ;;  %s837_s3 = inlined_call_operand.vmem [shape: bf16[64,32], index: 3, kind: input, shape index: {}]   ;;  %s838_s4 = inlined_call_operand.vmem [shape: f32[1,32], index: 4, kind: input, shape index: {}]   ;;  %s839_s5 = inlined_call_operand.hbm [shape: bf16[2,24,32], index: 5, kind: output, shape index: {}]  }
   0x1   :  { %12 = vsyncpa [#allocation3 + $0x1], 0  ;;  %s699_s18 = smov 0   ;;  %s701_s19 = smov 0  }
   0x2   :  { %s703_s20 = smov 0   ;;  %s705_s21 = smov 0  }
   0x3 LB: > { %s720_s22 = sadd.s32 4294967295, %s662_s21   ;;  %s487_s23 = sadd.s32 4294967294, %s662_s21   ;;  %s662_s21 = sphi %s705_s21, %s845_s21   ;;  %s658_s20 = sphi %s703_s20, %s844_s20   ;;  %s654_s19 = sphi %s701_s19, %s843_s19   ;;  %s650_s18 = sphi %s699_s18, %s842_s18  }
   0x4   : > { %s724_s24 = sadd.s32 1, %s662_s21   ;;  %s135_s25 = sadd.s32 1, %s658_s20 }
   0x5   : > { %s132_s26 = ssub.s32 %s662_s21, %s724_s24  ;;  %p145_p0 = scmp.ne.s32.totalorder %s658_s20, %s654_s19 }
   0x6   : > { %p133_p1 = scmp.eq.s32.totalorder %s132_s26, 0  ;;  %p146_p2 = scmp.eq.s32.totalorder %s720_s22, 1 }
   0x7   : > { %p151_p3 = scmp.ne.s32.totalorder %s654_s19, %s650_s18  ;;  %p152_p4 = scmp.eq.s32.totalorder %s487_s23, 1 }
   0x8   : > { %s735_s27 = scalar_select %p133_p1, %s658_s20, %s135_s25  }
   0x9   : > { %p737_p5 = por %p146_p2, %p145_p0  ;;  %p741_p6 = por %p152_p4, %p151_p3 }
   0xa   : > { %p490_p7 = scmp.ge.s32.totalorder %s662_s21, 1  ;;  %p190_p8 = scmp.lt.s32.totalorder %s662_s21, 3 }
   0xc   : > { %p191_p9 = pnand %p490_p7, %p190_p8 }
   0xd   : > { %p218_p10 = scmp.lt.s32.totalorder (!%p191_p9), %s720_s22, 1  ;;  %s215_s10 = sand.u32 (!%p191_p9), 1, %s654_s19  }
   0xe   : > { %194 = sbr.rel (%p191_p9) target bundleno = 251 (0xfb), region = 40  ;;  %s666_s7 = smov (!%p191_p9), [#allocation2]  }
   0xf   : > { %s548_s11 = smul.u32 (!%p191_p9), 12, %s215_s10  ;;  %s606_s8 = sshll.u32 (!%p191_p9), %s666_s7, 4  ;;  %s607_s8 = int_to_ptr.vmem [resolvable:$false] %s606_s8 }
  0x10   : > { %s549_s23 = smul.u32 (!%p191_p9), 192, %s720_s22  ;;  %s608_s9 = scalar_lea.vmem (!%p191_p9), %s607_s8, 384 }
  0x13   : > { %v593_v0 = vld [vmem:[%s835_s1 + $0x18] sm:$0xff]   ;;  %v664_v1 = vmov 0.0   ;;  %v595_v3 = vld [vmem:[%s835_s1 + $0x10] sm:$0xff]   ;;  %vm665_vm0 = vmmov 0   ;;  %s219_s13 = scalar_select %p218_p10, %s720_s22, 1  ;;  %v597_v5 = vld [vmem:[%s835_s1 + $0x8] sm:$0xff]  }
  0x14   : > { %524 = vmatprep.subr.bf16.mxu0 %v664_v1  ;;  %536 = vmatprep.subr.bf16.mxu1 %v664_v1  ;;  %v594_v2 = vld [vmem:[%s837_s3 + $0x18] sm:$0xff]   ;;  %v596_v4 = vld [vmem:[%s837_s3 + $0x10] sm:$0xff]   ;;  %v598_v6 = vld [vmem:[%s837_s3 + $0x8] sm:$0xff]   ;;  %vm270_vm1 = vcmask 523264   ;;  %vm323_vm2 = vcmask 257024   ;;  %s791_s22 = scalar_lea.hbm %s839_s5, %s549_s23 }
  0x15   : > { %525 = vmatpush3.bf16.msra.mxu0 %v593_v0  ;;  %532 = vmatprep.mubr.msk.bf16.mxu0 %vm665_vm0, %v664_v1  ;;  %s511_s16 = sshll.u32 %s219_s13, 3  ;;  %v599_v7 = vld [vmem:[%s835_s1] sm:$0xff]  }
  0x16   : > { %537 = vmatpush3.bf16.msra.mxu1 %v594_v2  ;;  %526 = vmatprep.subr.bf16.mxu0 %v664_v1  ;;  %s222_s30 = scalar_lea.vmem %s834_s0, %s511_s16  ;;  %v600_v8 = vld [vmem:[%s837_s3] sm:$0xff]   ;;  %s217_s16 = scalar_lea.vmem [#allocation2], %s548_s11 }
  0x17   : > { %538 = vmatprep.subr.bf16.mxu1 %v664_v1  ;;  %544 = vmatprep.mubr.msk.bf16.mxu1 %vm665_vm0, %v664_v1  ;;  %v601_v9 = vld [vmem:[%s222_s30] sm:$0xff]   ;;  %s425_s17 = sshll.u32 %s217_s16, 4  ;;  %s785_s17 = int_to_ptr.vmem [resolvable:$true] %s425_s17 }
  0x18   : > { %v326_v10 = vld [vmem:[%s222_s30] sm:$0xf]  ;;  %s794_s30 = scalar_lea.sflag [#allocation3], %s215_s10  ;;  %s602_s6 = scalar_lea.vmem %s785_s17, 192 }
  0x19   : > { %527 = vmatpush3.bf16.msra.mxu0 %v595_v3  ;;  %v493_v11 = vld [vmem:[%s836_s2] ss:$0 sm:$0xff]  ;;  %p603_p11 = scmp.ne.s32.totalorder %s785_s17, %s602_s6  ;;  %p609_p0 = scmp.lt.s32.totalorder %s785_s17, %s607_s8 }
  0x1a   : > { %539 = vmatpush3.bf16.msra.mxu1 %v596_v4  ;;  %528 = vmatprep.subr.bf16.mxu0 %v664_v1  ;;  %v502_v12 = vld [vmem:[%s838_s4] ss:$0 sm:$0xff]  ;;  %p610_p1 = scmp.lt.s32.totalorder %s608_s9, %s602_s6 }
  0x1b   : > { %540 = vmatprep.subr.bf16.mxu1 %v664_v1  ;;  %p604_p12 = pnand %p603_p11, %p737_p5 }
  0x1c   : > { %p611_p2 = por %p610_p1, %p609_p0 }
  0x1d   : > { %529 = vmatpush3.bf16.msra.mxu0 %v597_v5  ;;  %p605_p13 = pneg %p604_p12 }
  0x1e   : > { %541 = vmatpush3.bf16.msra.mxu1 %v598_v6  ;;  %530 = vmatprep.subr.bf16.mxu0 %v664_v1 }
  0x1f   : > { %542 = vmatprep.subr.bf16.mxu1 %v664_v1  ;;  %p612_p3 = pnand %p611_p2, %p605_p13 }
  0x21   : > { %531 = vmatpush3.bf16.msra.mxu0 %v599_v7 }
  0x22   : > { %543 = vmatpush3.bf16.msra.mxu1 %v600_v8 }
  0x24   : > { %533 = vmatmul.mubr.msk.bf16.vlgmr.msra.gmra.mxu0 %vm270_vm1, %v601_v9 }
  0x25   : > { %545 = vmatmul.mubr.msk.bf16.vlgmr.msra.gmra.mxu1 %vm270_vm1, %v326_v10 }
  0xe4   : > { %v308_v13 = vpop.f32.mrf.mxu0 }
  0xe5   : > { %v309_v14 = vadd.f32 %v493_v11, %v308_v13  ;;  %v403_v15 = vpop.f32.mrf.mxu1 }
  0xe6   : > { %v404_v16 = vadd.f32 %v502_v12, %v403_v15  ;;  %v534_v17 = vpop.f32.mrf.mxu0 }
  0xe7   : > { %v512_v18 = vpack.c.bf16 %v309_v14, %v309_v14  ;;  %v546_v19 = vpop.f32.mrf.mxu1 }
  0xe8   : > { %v409_v20 = vpack.c.bf16 %v404_v16, %v404_v16  ;;  %v311_v21 = vpop.f32.mrf.mxu0 }
  0xe9   : > { %324 = vst.msk [vmem:[%s217_s16] sm:$0xf] %vm323_vm2, %v512_v18  ;;  %v312_v22 = vadd.f32 %v493_v11, %v311_v21  ;;  %v406_v23 = vpop.f32.mrf.mxu1 }
  0xea   : > { %410 = vst.msk [vmem:[%s217_s16 + $0x8] sm:$0xf] %vm323_vm2, %v409_v20  ;;  %v535_v24 = vpop.f32.mrf.mxu0 }
  0xeb   : > { %v513_v25 = vpack.c.bf16 %v312_v22, %v312_v22  ;;  %v547_v26 = vpop.f32.mrf.mxu1 }
  0xed   : > { %325 = vst.msk [vmem:[%s217_s16 + $0x4] sm:$0xf] %vm323_vm2, %v513_v25 }
  0xee   : > { %615 = shalt.err (!%p612_p3)
}
  0xef   : > { %s616_s10 = scalar_lea.hbm %s791_s22, 192  ;;  %s620_s13 = scalar_lea.hbm %s839_s5, 384 }
  0xf0   : > { %p617_p4 = scmp.ne.s32.totalorder %s791_s22, %s616_s10  ;;  %p621_p9 = scmp.lt.s32.totalorder %s791_s22, %s839_s5 }
  0xf1   : > { %p622_p10 = scmp.lt.s32.totalorder %s620_s13, %s616_s10 }
  0xf2   : > { %p618_p7 = pnand %p617_p4, %p737_p5 }
  0xf3   : > { %p623_p11 = por %p622_p10, %p621_p9 }
  0xf4   : > { %p619_p8 = pneg %p618_p7 }
  0xf6   : > { %p624_p12 = pnand %p623_p11, %p619_p8 }
  0xf8   : > { %627 = shalt.err (!%p624_p12)
}
  0xf9   : > { %s667_s16 = smov 64   ;;  %s668_s23 = smov 4  }
  0xfa   : > { %550 = dma.vmem_to_hbm [thread:$0]  (%p737_p5), %s785_s17, 192, %s791_s22, %s794_s30, %s667_s16, %s667_s16, %s668_s23  }
  0xfb PF: > { %p556_p13 = scmp.ge.s32.totalorder %s662_s21, 2  ;;  %s440_s25 = sand.u32 1, %s650_s18  }
  0xfc   : > { %s441_s26 = scalar_lea.sflag [#allocation3], %s440_s25 }
  0xfd   : > { %p553_p0 = pnand %p556_p13, %p741_p6 }
  0xff   : > { %p554_p1 = pneg %p553_p0 }
 0x101   : > { %645 = dma.done.wait (%p554_p1), %s441_s26, 192  }
 0x102   : > { %647 = vsyncadd (%p554_p1), %s441_s26, 4294967104  ;;  %p15_p2 = scmp.ge.s32.totalorder %s724_s24, 4   ;;  %s842_s18 = smov %s654_s19 }
 0x103   : > { %s843_s19 = smov %s658_s20  ;;  %s844_s20 = smov %s735_s27 }
 0x104   : > { %s845_s21 = smov %s724_s24  ;;  %17 = sbr.rel (!%p15_p2) target bundleno = 3 (0x3), region = 75 }
 0x109   :  { %446 = vsyncpa [#allocation3], 1 }
 0x10a   :  { %448 = vsyncpa [#allocation3 + $0x1], 1 }

// kernel: tpu_custom_call.1
= control target key start
LH: loop header
LB: loop body
LE: loop exit
PB: predicated region body
PF: predicated region fallthrough
CT: control target
= control target key end

     0   :  { %10 = vsyncpa [#allocation3], 0  ;;  %s834_s0 = inlined_call_operand.vmem [shape: bf16[2,16,64], index: 0, kind: input, shape index: {}]   ;;  %s835_s1 = inlined_call_operand.vmem [shape: bf16[64,32], index: 1, kind: input, shape index: {}]   ;;  %s836_s2 = inlined_call_operand.vmem [shape: f32[1,32], index: 2, kind: input, shape index: {}]   ;;  %s837_s3 = inlined_call_operand.vmem [shape: bf16[64,32], index: 3, kind: input, shape index: {}]   ;;  %s838_s4 = inlined_call_operand.vmem [shape: f32[1,32], index: 4, kind: input, shape index: {}]   ;;  %s839_s5 = inlined_call_operand.hbm [shape: bf16[2,24,32], index: 5, kind: output, shape index: {}]  }
   0x1   :  { %12 = vsyncpa [#allocation3 + $0x1], 0  ;;  %s699_s18 = smov 0   ;;  %s701_s19 = smov 0  }
   0x2   :  { %s703_s20 = smov 0   ;;  %s705_s21 = smov 0  }
   0x3 LB: > { %s720_s22 = sadd.s32 4294967295, %s662_s21   ;;  %s487_s23 = sadd.s32 4294967294, %s662_s21   ;;  %s662_s21 = sphi %s705_s21, %s845_s21   ;;  %s658_s20 = sphi %s703_s20, %s844_s20   ;;  %s654_s19 = sphi %s701_s19, %s843_s19   ;;  %s650_s18 = sphi %s699_s18, %s842_s18  }
   0x4   : > { %s724_s24 = sadd.s32 1, %s662_s21   ;;  %s135_s25 = sadd.s32 1, %s658_s20 }
   0x5   : > { %s132_s26 = ssub.s32 %s662_s21, %s724_s24  ;;  %p145_p0 = scmp.ne.s32.totalorder %s658_s20, %s654_s19 }
   0x6   : > { %p133_p1 = scmp.eq.s32.totalorder %s132_s26, 0  ;;  %p146_p2 = scmp.eq.s32.totalorder %s720_s22, 1 }
   0x7   : > { %p151_p3 = scmp.ne.s32.totalorder %s654_s19, %s650_s18  ;;  %p152_p4 = scmp.eq.s32.totalorder %s487_s23, 1 }
   0x8   : > { %s735_s27 = scalar_select %p133_p1, %s658_s20, %s135_s25  }
   0x9   : > { %p737_p5 = por %p146_p2, %p145_p0  ;;  %p741_p6 = por %p152_p4, %p151_p3 }
   0xa   : > { %p490_p7 = scmp.ge.s32.totalorder %s662_s21, 1  ;;  %p190_p8 = scmp.lt.s32.totalorder %s662_s21, 3 }
   0xc   : > { %p191_p9 = pnand %p490_p7, %p190_p8 }
   0xd   : > { %p218_p10 = scmp.lt.s32.totalorder (!%p191_p9), %s720_s22, 1  ;;  %s215_s10 = sand.u32 (!%p191_p9), 1, %s654_s19  }
   0xe   : > { %194 = sbr.rel (%p191_p9) target bundleno = 251 (0xfb), region = 40  ;;  %s666_s7 = smov (!%p191_p9), [#allocation2]  }
   0xf   : > { %s548_s11 = smul.u32 (!%p191_p9), 12, %s215_s10  ;;  %s606_s8 = sshll.u32 (!%p191_p9), %s666_s7, 4  ;;  %s607_s8 = int_to_ptr.vmem [resolvable:$false] %s606_s8 }
  0x10   : > { %s549_s23 = smul.u32 (!%p191_p9), 192, %s720_s22  ;;  %s608_s9 = scalar_lea.vmem (!%p191_p9), %s607_s8, 384 }
  0x13   : > { %v593_v0 = vld [vmem:[%s835_s1 + $0x18] sm:$0xff]   ;;  %v664_v1 = vmov 0.0   ;;  %v595_v3 = vld [vmem:[%s835_s1 + $0x10] sm:$0xff]   ;;  %vm665_vm0 = vmmov 0   ;;  %s219_s13 = scalar_select %p218_p10, %s720_s22, 1  ;;  %v597_v5 = vld [vmem:[%s835_s1 + $0x8] sm:$0xff]  }
  0x14   : > { %524 = vmatprep.subr.bf16.mxu0 %v664_v1  ;;  %536 = vmatprep.subr.bf16.mxu1 %v664_v1  ;;  %v594_v2 = vld [vmem:[%s837_s3 + $0x18] sm:$0xff]   ;;  %v596_v4 = vld [vmem:[%s837_s3 + $0x10] sm:$0xff]   ;;  %v598_v6 = vld [vmem:[%s837_s3 + $0x8] sm:$0xff]   ;;  %vm270_vm1 = vcmask 523264   ;;  %vm323_vm2 = vcmask 257024   ;;  %s791_s22 = scalar_lea.hbm %s839_s5, %s549_s23 }
  0x15   : > { %525 = vmatpush3.bf16.msra.mxu0 %v593_v0  ;;  %532 = vmatprep.mubr.msk.bf16.mxu0 %vm665_vm0, %v664_v1  ;;  %s511_s16 = sshll.u32 %s219_s13, 3  ;;  %v599_v7 = vld [vmem:[%s835_s1] sm:$0xff]  }
  0x16   : > { %537 = vmatpush3.bf16.msra.mxu1 %v594_v2  ;;  %526 = vmatprep.subr.bf16.mxu0 %v664_v1  ;;  %s222_s30 = scalar_lea.vmem %s834_s0, %s511_s16  ;;  %v600_v8 = vld [vmem:[%s837_s3] sm:$0xff]   ;;  %s217_s16 = scalar_lea.vmem [#allocation2], %s548_s11 }
  0x17   : > { %538 = vmatprep.subr.bf16.mxu1 %v664_v1  ;;  %544 = vmatprep.mubr.msk.bf16.mxu1 %vm665_vm0, %v664_v1  ;;  %v601_v9 = vld [vmem:[%s222_s30] sm:$0xff]   ;;  %s425_s17 = sshll.u32 %s217_s16, 4  ;;  %s785_s17 = int_to_ptr.vmem [resolvable:$true] %s425_s17 }
  0x18   : > { %v326_v10 = vld [vmem:[%s222_s30] sm:$0xf]  ;;  %s794_s30 = scalar_lea.sflag [#allocation3], %s215_s10  ;;  %s602_s6 = scalar_lea.vmem %s785_s17, 192 }
  0x19   : > { %527 = vmatpush3.bf16.msra.mxu0 %v595_v3  ;;  %v493_v11 = vld [vmem:[%s836_s2] ss:$0 sm:$0xff]  ;;  %p603_p11 = scmp.ne.s32.totalorder %s785_s17, %s602_s6  ;;  %p609_p0 = scmp.lt.s32.totalorder %s785_s17, %s607_s8 }
  0x1a   : > { %539 = vmatpush3.bf16.msra.mxu1 %v596_v4  ;;  %528 = vmatprep.subr.bf16.mxu0 %v664_v1  ;;  %v502_v12 = vld [vmem:[%s838_s4] ss:$0 sm:$0xff]  ;;  %p610_p1 = scmp.lt.s32.totalorder %s608_s9, %s602_s6 }
  0x1b   : > { %540 = vmatprep.subr.bf16.mxu1 %v664_v1  ;;  %p604_p12 = pnand %p603_p11, %p737_p5 }
  0x1c   : > { %p611_p2 = por %p610_p1, %p609_p0 }
  0x1d   : > { %529 = vmatpush3.bf16.msra.mxu0 %v597_v5  ;;  %p605_p13 = pneg %p604_p12 }
  0x1e   : > { %541 = vmatpush3.bf16.msra.mxu1 %v598_v6  ;;  %530 = vmatprep.subr.bf16.mxu0 %v664_v1 }
  0x1f   : > { %542 = vmatprep.subr.bf16.mxu1 %v664_v1  ;;  %p612_p3 = pnand %p611_p2, %p605_p13 }
  0x21   : > { %531 = vmatpush3.bf16.msra.mxu0 %v599_v7 }
  0x22   : > { %543 = vmatpush3.bf16.msra.mxu1 %v600_v8 }
  0x24   : > { %533 = vmatmul.mubr.msk.bf16.vlgmr.msra.gmra.mxu0 %vm270_vm1, %v601_v9 }
  0x25   : > { %545 = vmatmul.mubr.msk.bf16.vlgmr.msra.gmra.mxu1 %vm270_vm1, %v326_v10 }
  0xe4   : > { %v308_v13 = vpop.f32.mrf.mxu0 }
  0xe5   : > { %v309_v14 = vadd.f32 %v493_v11, %v308_v13  ;;  %v403_v15 = vpop.f32.mrf.mxu1 }
  0xe6   : > { %v404_v16 = vadd.f32 %v502_v12, %v403_v15  ;;  %v534_v17 = vpop.f32.mrf.mxu0 }
  0xe7   : > { %v512_v18 = vpack.c.bf16 %v309_v14, %v309_v14  ;;  %v546_v19 = vpop.f32.mrf.mxu1 }
  0xe8   : > { %v409_v20 = vpack.c.bf16 %v404_v16, %v404_v16  ;;  %v311_v21 = vpop.f32.mrf.mxu0 }
  0xe9   : > { %324 = vst.msk [vmem:[%s217_s16] sm:$0xf] %vm323_vm2, %v512_v18  ;;  %v312_v22 = vadd.f32 %v493_v11, %v311_v21  ;;  %v406_v23 = vpop.f32.mrf.mxu1 }
  0xea   : > { %410 = vst.msk [vmem:[%s217_s16 + $0x8] sm:$0xf] %vm323_vm2, %v409_v20  ;;  %v535_v24 = vpop.f32.mrf.mxu0 }
  0xeb   : > { %v513_v25 = vpack.c.bf16 %v312_v22, %v312_v22  ;;  %v547_v26 = vpop.f32.mrf.mxu1 }
  0xed   : > { %325 = vst.msk [vmem:[%s217_s16 + $0x4] sm:$0xf] %vm323_vm2, %v513_v25 }
  0xee   : > { %615 = shalt.err (!%p612_p3)
}
  0xef   : > { %s616_s10 = scalar_lea.hbm %s791_s22, 192  ;;  %s620_s13 = scalar_lea.hbm %s839_s5, 384 }
  0xf0   : > { %p617_p4 = scmp.ne.s32.totalorder %s791_s22, %s616_s10  ;;  %p621_p9 = scmp.lt.s32.totalorder %s791_s22, %s839_s5 }
  0xf1   : > { %p622_p10 = scmp.lt.s32.totalorder %s620_s13, %s616_s10 }
  0xf2   : > { %p618_p7 = pnand %p617_p4, %p737_p5 }
  0xf3   : > { %p623_p11 = por %p622_p10, %p621_p9 }
  0xf4   : > { %p619_p8 = pneg %p618_p7 }
  0xf6   : > { %p624_p12 = pnand %p623_p11, %p619_p8 }
  0xf8   : > { %627 = shalt.err (!%p624_p12)
}
  0xf9   : > { %s667_s16 = smov 64   ;;  %s668_s23 = smov 4  }
  0xfa   : > { %550 = dma.vmem_to_hbm [thread:$0]  (%p737_p5), %s785_s17, 192, %s791_s22, %s794_s30, %s667_s16, %s667_s16, %s668_s23  }
  0xfb PF: > { %p556_p13 = scmp.ge.s32.totalorder %s662_s21, 2  ;;  %s440_s25 = sand.u32 1, %s650_s18  }
  0xfc   : > { %s441_s26 = scalar_lea.sflag [#allocation3], %s440_s25 }
  0xfd   : > { %p553_p0 = pnand %p556_p13, %p741_p6 }
  0xff   : > { %p554_p1 = pneg %p553_p0 }
 0x101   : > { %645 = dma.done.wait (%p554_p1), %s441_s26, 192  }
 0x102   : > { %647 = vsyncadd (%p554_p1), %s441_s26, 4294967104  ;;  %p15_p2 = scmp.ge.s32.totalorder %s724_s24, 4   ;;  %s842_s18 = smov %s654_s19 }
 0x103   : > { %s843_s19 = smov %s658_s20  ;;  %s844_s20 = smov %s735_s27 }
 0x104   : > { %s845_s21 = smov %s724_s24  ;;  %17 = sbr.rel (!%p15_p2) target bundleno = 3 (0x3), region = 75 }
 0x109   :  { %446 = vsyncpa [#allocation3], 1 }
 0x10a   :  { %448 = vsyncpa [#allocation3 + $0x1], 1 }

</bundles_post_ra>
